<compile_context>
chip_gen: v7x
topology: tpu7x:2x2x1
jax: 0.10.0
libtpu: 0.0.40
codegen_flags: <defaults>
</compile_context>

<pallas_src>
import functools

import jax
import jax.numpy as jnp
from jax.experimental import pallas as pl
from jax.experimental.pallas import tpu as pltpu


def _round_up(n, m):
    return ((n + m - 1) // m) * m


# ----------------------------------------------------------------------------
# Fused kernel
# ----------------------------------------------------------------------------
def fused_forward_kernel(x_ref, amat_ref, vecs_ref, wmat_ref, out_ref, *, dconv):
    # x_ref    : VMEM [N, 2*S]      f32   flattened input points
    # amat_ref : VMEM [2, 2*S, DP]  bf16  unrolled-conv / passthrough matrices
    # vecs_ref : VMEM [13, DP]      f32   conv bias, BN gammas/betas, linear biases
    # wmat_ref : VMEM [4, DP, DP]   bf16  zero-padded Linear weights
    # out_ref  : VMEM [N, DP]       f32   padded output (cols >= out_dim are 0)
    eps = 1e-5

    def batch_norm(h, g, b):
        # training-mode BatchNorm1d: per-feature batch mean / biased variance
        mean = jnp.mean(h, axis=0, keepdims=True)
        var = jnp.mean(jnp.square(h - mean), axis=0, keepdims=True)
        return g * (h - mean) * jax.lax.rsqrt(var + eps) + b

    def linear(h, layer):
        # bf16 operands, f32 accumulation (MXU-native); bias add in f32.
        return (jnp.dot(h.astype(jnp.bfloat16), wmat_ref[layer],
                        preferred_element_type=jnp.float32)
                + vecs_ref[3 * layer + 3:3 * layer + 4, :])

    # conv(2,1) + maxpool(2,1,stride=1) + relu + flatten + concat, all via
    # two lane-dense matmuls and a masked ReLU (inner-point columns pass
    # through un-rectified; padded columns stay exactly zero).
    xb = x_ref[...].astype(jnp.bfloat16)
    c0 = jnp.dot(xb, amat_ref[0], preferred_element_type=jnp.float32)
    c1 = jnp.dot(xb, amat_ref[1], preferred_element_type=jnp.float32)
    v = jnp.maximum(c0, c1) + vecs_ref[0:1, :]
    col = jax.lax.broadcasted_iota(jnp.int32, v.shape, 1)
    h = jnp.where(col < dconv, jnp.maximum(v, 0.0), v)

    # fc: (BN -> Linear -> Tanh) x3 -> BN -> Linear
    h = batch_norm(h, vecs_ref[1:2, :], vecs_ref[2:3, :])
    h = jnp.tanh(linear(h, 0))
    h = batch_norm(h, vecs_ref[4:5, :], vecs_ref[5:6, :])
    h = jnp.tanh(linear(h, 1))
    h = batch_norm(h, vecs_ref[7:8, :], vecs_ref[8:9, :])
    h = jnp.tanh(linear(h, 2))
    h = batch_norm(h, vecs_ref[10:11, :], vecs_ref[11:12, :])
    out_ref[...] = linear(h, 3)


# ----------------------------------------------------------------------------
# Wrapper
# ----------------------------------------------------------------------------
def alt_2d_conv_net_forward(x, packed, *, out_dimension):
    """x: [N, S, 2] (channel-squeezed PyTorch NCHW input). Returns [N, out_dim]."""
    N = x.shape[0]
    x_flat = x.reshape(N, -1).astype(jnp.float32)          # [N, 2*S]
    out_pad = pl.pallas_call(
        functools.partial(fused_forward_kernel, dconv=packed["dconv"]),
        out_shape=jax.ShapeDtypeStruct((N, packed["dp"]), jnp.float32),
        in_specs=[pl.BlockSpec(memory_space=pltpu.MemorySpace.VMEM)] * 4,
        out_specs=pl.BlockSpec(memory_space=pltpu.MemorySpace.VMEM),
    )(x_flat, packed["amat"], packed["vecs"], packed["wmat"])
    return out_pad[:, :out_dimension]


# ----------------------------------------------------------------------------
# One-time parameter packing (layout plumbing done at setup time, not per step)
# ----------------------------------------------------------------------------
def pack_params(params, *, nb_of_filters, nb_of_edges, nb_of_points,
                nb_of_hidden_nodes, out_dimension):
    F, E, P = nb_of_filters, nb_of_edges, nb_of_points
    H, O = nb_of_hidden_nodes, out_dimension
    dconv = 2 * F * (E - 1)                 # flattened conv feature width
    d0 = dconv + 2 * P                      # fc input width
    din = 2 * (E + 1 + P)                   # flattened input width (= 2*S)
    dp = _round_up(max(d0, H, O), 128)      # common padded lane width
    f32 = jnp.float32

    conv_w = params["conv_w"].astype(f32)   # [F, 2]  (Conv2d weight [F,1,2,1])
    conv_b = params["conv_b"].astype(f32)   # [F]

    # Flattened conv layout: k = f*(E-1)*2 + e*2 + c  (matches torch .view()).
    f_idx = jnp.repeat(jnp.arange(F), (E - 1) * 2)
    e_idx = jnp.tile(jnp.repeat(jnp.arange(E - 1), 2), F)
    c_idx = jnp.tile(jnp.arange(2), F * (E - 1))
    k_idx = jnp.arange(dconv)

    # A0 produces conv[n,f,e,c], A1 produces conv[n,f,e+1,c] (the two maxpool
    # candidates); both also pass the inner points through unchanged.
    a0 = jnp.zeros((din, dp), f32)
    a1 = jnp.zeros((din, dp), f32)
    a0 = a0.at[2 * e_idx + c_idx, k_idx].add(conv_w[f_idx, 0])
    a0 = a0.at[2 * (e_idx + 1) + c_idx, k_idx].add(conv_w[f_idx, 1])
    a1 = a1.at[2 * (e_idx + 1) + c_idx, k_idx].add(conv_w[f_idx, 0])
    a1 = a1.at[2 * (e_idx + 2) + c_idx, k_idx].add(conv_w[f_idx, 1])
    j_idx = jnp.arange(2 * P)
    a0 = a0.at[2 * (E + 1) + j_idx, dconv + j_idx].set(1.0)
    a1 = a1.at[2 * (E + 1) + j_idx, dconv + j_idx].set(1.0)
    amat = jnp.stack([a0, a1]).astype(jnp.bfloat16)        # [2, din, dp]

    def padv(v):
        v = v.reshape(-1).astype(f32)
        return jnp.zeros((dp,), f32).at[: v.shape[0]].set(v)

    vecs = jnp.stack([
        padv(conv_b[f_idx]),                                # conv bias, flattened
        padv(params["g0"]), padv(params["be0"]),
        padv(params["b1"]), padv(params["g1"]), padv(params["be1"]),
        padv(params["b2"]), padv(params["g2"]), padv(params["be2"]),
        padv(params["b3"]), padv(params["g3"]), padv(params["be3"]),
        padv(params["b4"]),
    ])                                                      # [13, dp]

    def padw(w):
        return jnp.zeros((dp, dp), f32).at[: w.shape[0], : w.shape[1]].set(w)

    wmat = jnp.stack([padw(params["w1"]), padw(params["w2"]),
                      padw(params["w3"]), padw(params["w4"])]).astype(jnp.bfloat16)

    return dict(amat=amat, vecs=vecs, wmat=wmat, dconv=dconv, d0=d0, dp=dp)


# ----------------------------------------------------------------------------
# Deterministic parameter construction (mirrors the PyTorch module layers)
# ----------------------------------------------------------------------------
def make_params(key, *, nb_of_filters, nb_of_hidden_nodes, out_dimension,
                nb_of_edges, nb_of_points):
    F, H, O = nb_of_filters, nb_of_hidden_nodes, out_dimension
    D0 = 2 * F * (nb_of_edges - 1) + 2 * nb_of_points
    keys = jax.random.split(key, 6)

    def lin(k, fan_in, fan_out):
        scale = 1.0 / jnp.sqrt(jnp.float32(fan_in))
        kw, kb = jax.random.split(k)
        w = jax.random.uniform(kw, (fan_in, fan_out), jnp.float32, -scale, scale)
        b = jax.random.uniform(kb, (1, fan_out), jnp.float32, -scale, scale)
        return w, b

    conv_w = jax.random.uniform(keys[0], (F, 2), jnp.float32, -0.7, 0.7)
    conv_b = jax.random.uniform(keys[1], (F,), jnp.float32, -0.7, 0.7)
    w1, b1 = lin(keys[2], D0, H)
    w2, b2 = lin(keys[3], H, H)
    w3, b3 = lin(keys[4], H, H)
    w4, b4 = lin(keys[5], H, O)

    def bn_params(dim):
        return jnp.ones((1, dim), jnp.float32), jnp.zeros((1, dim), jnp.float32)

    g0, be0 = bn_params(D0)
    g1, be1 = bn_params(H)
    g2, be2 = bn_params(H)
    g3, be3 = bn_params(H)
    return dict(conv_w=conv_w, conv_b=conv_b,
                w1=w1, b1=b1, w2=w2, b2=b2, w3=w3, b3=b3, w4=w4, b4=b4,
                g0=g0, be0=be0, g1=g1, be1=be1, g2=g2, be2=be2, g3=g3, be3=be3)


# ----------------------------------------------------------------------------
# Pure-JAX reference (unfused, straightforward ops) used for an in-script
# sanity check. Matmul / conv operands are rounded to bf16 (accumulate f32)
# to mirror the kernel's precision policy so the comparison isolates
# fusion / layout / packing bugs.
# ----------------------------------------------------------------------------
def reference_forward(x, params, *, nb_of_filters, nb_of_edges, nb_of_points):
    f32 = jnp.float32
    rnd = lambda a: a.astype(jnp.bfloat16).astype(f32)
    N = x.shape[0]
    E, P, F = nb_of_edges, nb_of_points, nb_of_filters

    poly = rnd(x[:, :E + 1, :])                                  # [N, E+1, 2]
    inner = rnd(x[:, E + 1:E + 1 + P, :]).reshape(N, 2 * P)      # [N, 2P]
    w = rnd(params["conv_w"])
    w0 = w[:, 0][None, :, None, None]
    w1 = w[:, 1][None, :, None, None]
    bb = params["conv_b"][None, :, None, None]
    conv = poly[:, None, :E, :] * w0 + poly[:, None, 1:, :] * w1 + bb   # [N,F,E,2]
    pooled = jnp.maximum(conv[:, :, :E - 1, :], conv[:, :, 1:, :])      # [N,F,E-1,2]
    act = jnp.maximum(pooled, 0.0)
    feat = jnp.concatenate([act.reshape(N, F * (E - 1) * 2), inner], axis=1)

    def bn(h, g, b):
        m = jnp.mean(h, axis=0, keepdims=True)
        v = jnp.mean(jnp.square(h - m), axis=0, keepdims=True)
        return g * (h - m) * jax.lax.rsqrt(v + 1e-5) + b

    h = bn(feat, params["g0"], params["be0"])
    h = jnp.tanh(jnp.dot(rnd(h), rnd(params["w1"])) + params["b1"])
    h = bn(h, params["g1"], params["be1"])
    h = jnp.tanh(jnp.dot(rnd(h), rnd(params["w2"])) + params["b2"])
    h = bn(h, params["g2"], params["be2"])
    h = jnp.tanh(jnp.dot(rnd(h), rnd(params["w3"])) + params["b3"])
    h = bn(h, params["g3"], params["be3"])
    return jnp.dot(rnd(h), rnd(params["w4"])) + params["b4"]


if __name__ == "__main__":
    # Small, forward-consistent sizes.
    nb_of_filters = 4
    nb_of_hidden_nodes = 32
    out_dimension = 8
    nb_of_edges = 9
    nb_of_points = 8
    N = 8  # batch (>1 so training-mode BatchNorm is well defined)

    S = (nb_of_edges + 1) + nb_of_points      # 18 rows of (x, y) points
    key = jax.random.PRNGKey(0)
    kx, kp = jax.random.split(key)

    # PyTorch input would be [N, 1, S, 2]; we carry the channel-squeezed [N, S, 2].
    x = jax.random.normal(kx, (N, S, 2), jnp.float32)

    params = make_params(
        kp, nb_of_filters=nb_of_filters, nb_of_hidden_nodes=nb_of_hidden_nodes,
        out_dimension=out_dimension, nb_of_edges=nb_of_edges,
        nb_of_points=nb_of_points)
    packed = pack_params(
        params, nb_of_filters=nb_of_filters, nb_of_edges=nb_of_edges,
        nb_of_points=nb_of_points, nb_of_hidden_nodes=nb_of_hidden_nodes,
        out_dimension=out_dimension)

    out = alt_2d_conv_net_forward(x, packed, out_dimension=out_dimension)
    out = jax.block_until_ready(out)

    ref = jax.block_until_ready(reference_forward(
        x, params, nb_of_filters=nb_of_filters, nb_of_edges=nb_of_edges,
        nb_of_points=nb_of_points))

    assert out.shape == (N, out_dimension)
    assert bool(jnp.all(jnp.isfinite(out)))
    max_err = float(jnp.max(jnp.abs(out - ref)))
    assert max_err < 5e-3, f"mismatch vs reference: {max_err}"
    print("KERNEL_OK")
</pallas_src>

<mosaic_0001>
module attributes {stable_mosaic.version = 11 : i64} {
  func.func @fused_forward_kernel(%arg0: memref<8x36xf32, #tpu.memory_space<vmem>>, %arg1: memref<2x36x128xbf16, #tpu.memory_space<vmem>>, %arg2: memref<13x128xf32, #tpu.memory_space<vmem>>, %arg3: memref<4x128x128xbf16, #tpu.memory_space<vmem>>, %arg4: memref<8x128xf32, #tpu.memory_space<vmem>>) attributes {dimension_semantics = [], scalar_prefetch = 0 : i64, scratch_operands = 0 : i64, tpu.core_type = #tpu.core_type<tc>} {
    %c0 = arith.constant 0 : index
    %c0_0 = arith.constant 0 : index
    %0 = vector.load %arg0[%c0, %c0_0] : memref<8x36xf32, #tpu.memory_space<vmem>>, vector<8x36xf32>
    %1 = arith.truncf %0 : vector<8x36xf32> to vector<8x36xbf16>
    %c0_1 = arith.constant 0 : index
    %c0_2 = arith.constant 0 : index
    %c0_3 = arith.constant 0 : index
    %2 = vector.load %arg1[%c0_1, %c0_2, %c0_3] : memref<2x36x128xbf16, #tpu.memory_space<vmem>>, vector<1x36x128xbf16>
    %3 = vector.shape_cast %2 : vector<1x36x128xbf16> to vector<36x128xbf16>
    %cst = arith.constant dense<0.000000e+00> : vector<8x128xf32>
    %4 = tpu.matmul %1, %3, %cst {dimension_numbers = #tpu.dot_dimension_numbers<[1], [0], [0], [1], [0, 0, 1, 1], [], []>} : vector<8x36xbf16>, vector<36x128xbf16>, vector<8x128xf32> -> vector<8x128xf32>
    %c1 = arith.constant 1 : index
    %c0_4 = arith.constant 0 : index
    %c0_5 = arith.constant 0 : index
    %5 = vector.load %arg1[%c1, %c0_4, %c0_5] : memref<2x36x128xbf16, #tpu.memory_space<vmem>>, vector<1x36x128xbf16>
    %6 = vector.shape_cast %5 : vector<1x36x128xbf16> to vector<36x128xbf16>
    %cst_6 = arith.constant dense<0.000000e+00> : vector<8x128xf32>
    %7 = tpu.matmul %1, %6, %cst_6 {dimension_numbers = #tpu.dot_dimension_numbers<[1], [0], [0], [1], [0, 0, 1, 1], [], []>} : vector<8x36xbf16>, vector<36x128xbf16>, vector<8x128xf32> -> vector<8x128xf32>
    %8 = arith.maximumf %4, %7 : vector<8x128xf32>
    %c0_7 = arith.constant 0 : index
    %c0_8 = arith.constant 0 : index
    %9 = vector.load %arg2[%c0_7, %c0_8] : memref<13x128xf32, #tpu.memory_space<vmem>>, vector<1x128xf32>
    %10 = vector.broadcast %9 : vector<1x128xf32> to vector<8x128xf32>
    %11 = arith.addf %8, %10 : vector<8x128xf32>
    %12 = tpu.iota {dimensions = array<i32: 1>} : vector<8x128xi32>
    %c64_i32 = arith.constant 64 : i32
    %13 = vector.broadcast %c64_i32 : i32 to vector<8x128xi32>
    %14 = arith.cmpi slt, %12, %13 : vector<8x128xi32>
    %cst_9 = arith.constant 0.000000e+00 : f32
    %15 = vector.broadcast %cst_9 : f32 to vector<8x128xf32>
    %16 = arith.maximumf %11, %15 : vector<8x128xf32>
    %17 = arith.select %14, %16, %11 : vector<8x128xi1>, vector<8x128xf32>
    %c1_10 = arith.constant 1 : index
    %c0_11 = arith.constant 0 : index
    %18 = vector.load %arg2[%c1_10, %c0_11] : memref<13x128xf32, #tpu.memory_space<vmem>>, vector<1x128xf32>
    %c2 = arith.constant 2 : index
    %c0_12 = arith.constant 0 : index
    %19 = vector.load %arg2[%c2, %c0_12] : memref<13x128xf32, #tpu.memory_space<vmem>>, vector<1x128xf32>
    %cst_13 = arith.constant dense<0.000000e+00> : vector<128xf32>
    %20 = vector.multi_reduction <add>, %17, %cst_13 [0] : vector<8x128xf32> to vector<128xf32>
    %21 = vector.shape_cast %20 : vector<128xf32> to vector<1x128xf32>
    %cst_14 = arith.constant 8.000000e+00 : f32
    %22 = vector.broadcast %cst_14 : f32 to vector<1x128xf32>
    %23 = arith.divf %21, %22 : vector<1x128xf32>
    %24 = vector.broadcast %23 : vector<1x128xf32> to vector<8x128xf32>
    %25 = arith.subf %17, %24 : vector<8x128xf32>
    %26 = arith.mulf %25, %25 : vector<8x128xf32>
    %cst_15 = arith.constant dense<0.000000e+00> : vector<128xf32>
    %27 = vector.multi_reduction <add>, %26, %cst_15 [0] : vector<8x128xf32> to vector<128xf32>
    %28 = vector.shape_cast %27 : vector<128xf32> to vector<1x128xf32>
    %cst_16 = arith.constant 8.000000e+00 : f32
    %29 = vector.broadcast %cst_16 : f32 to vector<1x128xf32>
    %30 = arith.divf %28, %29 : vector<1x128xf32>
    %31 = vector.broadcast %23 : vector<1x128xf32> to vector<8x128xf32>
    %32 = arith.subf %17, %31 : vector<8x128xf32>
    %33 = vector.broadcast %18 : vector<1x128xf32> to vector<8x128xf32>
    %34 = arith.mulf %33, %32 : vector<8x128xf32>
    %cst_17 = arith.constant 9.99999974E-6 : f32
    %35 = vector.broadcast %cst_17 : f32 to vector<1x128xf32>
    %36 = arith.addf %30, %35 : vector<1x128xf32>
    %37 = math.rsqrt %36 : vector<1x128xf32>
    %38 = vector.broadcast %37 : vector<1x128xf32> to vector<8x128xf32>
    %39 = arith.mulf %34, %38 : vector<8x128xf32>
    %40 = vector.broadcast %19 : vector<1x128xf32> to vector<8x128xf32>
    %41 = arith.addf %39, %40 : vector<8x128xf32>
    %42 = arith.truncf %41 : vector<8x128xf32> to vector<8x128xbf16>
    %c0_18 = arith.constant 0 : index
    %c0_19 = arith.constant 0 : index
    %c0_20 = arith.constant 0 : index
    %43 = vector.load %arg3[%c0_18, %c0_19, %c0_20] : memref<4x128x128xbf16, #tpu.memory_space<vmem>>, vector<1x128x128xbf16>
    %44 = vector.shape_cast %43 : vector<1x128x128xbf16> to vector<128x128xbf16>
    %cst_21 = arith.constant dense<0.000000e+00> : vector<8x128xf32>
    %45 = tpu.matmul %42, %44, %cst_21 {dimension_numbers = #tpu.dot_dimension_numbers<[1], [0], [0], [1], [0, 0, 1, 1], [], []>} : vector<8x128xbf16>, vector<128x128xbf16>, vector<8x128xf32> -> vector<8x128xf32>
    %c3 = arith.constant 3 : index
    %c0_22 = arith.constant 0 : index
    %46 = vector.load %arg2[%c3, %c0_22] : memref<13x128xf32, #tpu.memory_space<vmem>>, vector<1x128xf32>
    %47 = vector.broadcast %46 : vector<1x128xf32> to vector<8x128xf32>
    %48 = arith.addf %45, %47 : vector<8x128xf32>
    %49 = math.tanh %48 : vector<8x128xf32>
    %c4 = arith.constant 4 : index
    %c0_23 = arith.constant 0 : index
    %50 = vector.load %arg2[%c4, %c0_23] : memref<13x128xf32, #tpu.memory_space<vmem>>, vector<1x128xf32>
    %c5 = arith.constant 5 : index
    %c0_24 = arith.constant 0 : index
    %51 = vector.load %arg2[%c5, %c0_24] : memref<13x128xf32, #tpu.memory_space<vmem>>, vector<1x128xf32>
    %cst_25 = arith.constant dense<0.000000e+00> : vector<128xf32>
    %52 = vector.multi_reduction <add>, %49, %cst_25 [0] : vector<8x128xf32> to vector<128xf32>
    %53 = vector.shape_cast %52 : vector<128xf32> to vector<1x128xf32>
    %cst_26 = arith.constant 8.000000e+00 : f32
    %54 = vector.broadcast %cst_26 : f32 to vector<1x128xf32>
    %55 = arith.divf %53, %54 : vector<1x128xf32>
    %56 = vector.broadcast %55 : vector<1x128xf32> to vector<8x128xf32>
    %57 = arith.subf %49, %56 : vector<8x128xf32>
    %58 = arith.mulf %57, %57 : vector<8x128xf32>
    %cst_27 = arith.constant dense<0.000000e+00> : vector<128xf32>
    %59 = vector.multi_reduction <add>, %58, %cst_27 [0] : vector<8x128xf32> to vector<128xf32>
    %60 = vector.shape_cast %59 : vector<128xf32> to vector<1x128xf32>
    %cst_28 = arith.constant 8.000000e+00 : f32
    %61 = vector.broadcast %cst_28 : f32 to vector<1x128xf32>
    %62 = arith.divf %60, %61 : vector<1x128xf32>
    %63 = vector.broadcast %55 : vector<1x128xf32> to vector<8x128xf32>
    %64 = arith.subf %49, %63 : vector<8x128xf32>
    %65 = vector.broadcast %50 : vector<1x128xf32> to vector<8x128xf32>
    %66 = arith.mulf %65, %64 : vector<8x128xf32>
    %cst_29 = arith.constant 9.99999974E-6 : f32
    %67 = vector.broadcast %cst_29 : f32 to vector<1x128xf32>
    %68 = arith.addf %62, %67 : vector<1x128xf32>
    %69 = math.rsqrt %68 : vector<1x128xf32>
    %70 = vector.broadcast %69 : vector<1x128xf32> to vector<8x128xf32>
    %71 = arith.mulf %66, %70 : vector<8x128xf32>
    %72 = vector.broadcast %51 : vector<1x128xf32> to vector<8x128xf32>
    %73 = arith.addf %71, %72 : vector<8x128xf32>
    %74 = arith.truncf %73 : vector<8x128xf32> to vector<8x128xbf16>
    %c1_30 = arith.constant 1 : index
    %c0_31 = arith.constant 0 : index
    %c0_32 = arith.constant 0 : index
    %75 = vector.load %arg3[%c1_30, %c0_31, %c0_32] : memref<4x128x128xbf16, #tpu.memory_space<vmem>>, vector<1x128x128xbf16>
    %76 = vector.shape_cast %75 : vector<1x128x128xbf16> to vector<128x128xbf16>
    %cst_33 = arith.constant dense<0.000000e+00> : vector<8x128xf32>
    %77 = tpu.matmul %74, %76, %cst_33 {dimension_numbers = #tpu.dot_dimension_numbers<[1], [0], [0], [1], [0, 0, 1, 1], [], []>} : vector<8x128xbf16>, vector<128x128xbf16>, vector<8x128xf32> -> vector<8x128xf32>
    %c6 = arith.constant 6 : index
    %c0_34 = arith.constant 0 : index
    %78 = vector.load %arg2[%c6, %c0_34] : memref<13x128xf32, #tpu.memory_space<vmem>>, vector<1x128xf32>
    %79 = vector.broadcast %78 : vector<1x128xf32> to vector<8x128xf32>
    %80 = arith.addf %77, %79 : vector<8x128xf32>
    %81 = math.tanh %80 : vector<8x128xf32>
    %c7 = arith.constant 7 : index
    %c0_35 = arith.constant 0 : index
    %82 = vector.load %arg2[%c7, %c0_35] : memref<13x128xf32, #tpu.memory_space<vmem>>, vector<1x128xf32>
    %c8 = arith.constant 8 : index
    %c0_36 = arith.constant 0 : index
    %83 = vector.load %arg2[%c8, %c0_36] : memref<13x128xf32, #tpu.memory_space<vmem>>, vector<1x128xf32>
    %cst_37 = arith.constant dense<0.000000e+00> : vector<128xf32>
    %84 = vector.multi_reduction <add>, %81, %cst_37 [0] : vector<8x128xf32> to vector<128xf32>
    %85 = vector.shape_cast %84 : vector<128xf32> to vector<1x128xf32>
    %cst_38 = arith.constant 8.000000e+00 : f32
    %86 = vector.broadcast %cst_38 : f32 to vector<1x128xf32>
    %87 = arith.divf %85, %86 : vector<1x128xf32>
    %88 = vector.broadcast %87 : vector<1x128xf32> to vector<8x128xf32>
    %89 = arith.subf %81, %88 : vector<8x128xf32>
    %90 = arith.mulf %89, %89 : vector<8x128xf32>
    %cst_39 = arith.constant dense<0.000000e+00> : vector<128xf32>
    %91 = vector.multi_reduction <add>, %90, %cst_39 [0] : vector<8x128xf32> to vector<128xf32>
    %92 = vector.shape_cast %91 : vector<128xf32> to vector<1x128xf32>
    %cst_40 = arith.constant 8.000000e+00 : f32
    %93 = vector.broadcast %cst_40 : f32 to vector<1x128xf32>
    %94 = arith.divf %92, %93 : vector<1x128xf32>
    %95 = vector.broadcast %87 : vector<1x128xf32> to vector<8x128xf32>
    %96 = arith.subf %81, %95 : vector<8x128xf32>
    %97 = vector.broadcast %82 : vector<1x128xf32> to vector<8x128xf32>
    %98 = arith.mulf %97, %96 : vector<8x128xf32>
    %cst_41 = arith.constant 9.99999974E-6 : f32
    %99 = vector.broadcast %cst_41 : f32 to vector<1x128xf32>
    %100 = arith.addf %94, %99 : vector<1x128xf32>
    %101 = math.rsqrt %100 : vector<1x128xf32>
    %102 = vector.broadcast %101 : vector<1x128xf32> to vector<8x128xf32>
    %103 = arith.mulf %98, %102 : vector<8x128xf32>
    %104 = vector.broadcast %83 : vector<1x128xf32> to vector<8x128xf32>
    %105 = arith.addf %103, %104 : vector<8x128xf32>
    %106 = arith.truncf %105 : vector<8x128xf32> to vector<8x128xbf16>
    %c2_42 = arith.constant 2 : index
    %c0_43 = arith.constant 0 : index
    %c0_44 = arith.constant 0 : index
    %107 = vector.load %arg3[%c2_42, %c0_43, %c0_44] : memref<4x128x128xbf16, #tpu.memory_space<vmem>>, vector<1x128x128xbf16>
    %108 = vector.shape_cast %107 : vector<1x128x128xbf16> to vector<128x128xbf16>
    %cst_45 = arith.constant dense<0.000000e+00> : vector<8x128xf32>
    %109 = tpu.matmul %106, %108, %cst_45 {dimension_numbers = #tpu.dot_dimension_numbers<[1], [0], [0], [1], [0, 0, 1, 1], [], []>} : vector<8x128xbf16>, vector<128x128xbf16>, vector<8x128xf32> -> vector<8x128xf32>
    %c9 = arith.constant 9 : index
    %c0_46 = arith.constant 0 : index
    %110 = vector.load %arg2[%c9, %c0_46] : memref<13x128xf32, #tpu.memory_space<vmem>>, vector<1x128xf32>
    %111 = vector.broadcast %110 : vector<1x128xf32> to vector<8x128xf32>
    %112 = arith.addf %109, %111 : vector<8x128xf32>
    %113 = math.tanh %112 : vector<8x128xf32>
    %c10 = arith.constant 10 : index
    %c0_47 = arith.constant 0 : index
    %114 = vector.load %arg2[%c10, %c0_47] : memref<13x128xf32, #tpu.memory_space<vmem>>, vector<1x128xf32>
    %c11 = arith.constant 11 : index
    %c0_48 = arith.constant 0 : index
    %115 = vector.load %arg2[%c11, %c0_48] : memref<13x128xf32, #tpu.memory_space<vmem>>, vector<1x128xf32>
    %cst_49 = arith.constant dense<0.000000e+00> : vector<128xf32>
    %116 = vector.multi_reduction <add>, %113, %cst_49 [0] : vector<8x128xf32> to vector<128xf32>
    %117 = vector.shape_cast %116 : vector<128xf32> to vector<1x128xf32>
    %cst_50 = arith.constant 8.000000e+00 : f32
    %118 = vector.broadcast %cst_50 : f32 to vector<1x128xf32>
    %119 = arith.divf %117, %118 : vector<1x128xf32>
    %120 = vector.broadcast %119 : vector<1x128xf32> to vector<8x128xf32>
    %121 = arith.subf %113, %120 : vector<8x128xf32>
    %122 = arith.mulf %121, %121 : vector<8x128xf32>
    %cst_51 = arith.constant dense<0.000000e+00> : vector<128xf32>
    %123 = vector.multi_reduction <add>, %122, %cst_51 [0] : vector<8x128xf32> to vector<128xf32>
    %124 = vector.shape_cast %123 : vector<128xf32> to vector<1x128xf32>
    %cst_52 = arith.constant 8.000000e+00 : f32
    %125 = vector.broadcast %cst_52 : f32 to vector<1x128xf32>
    %126 = arith.divf %124, %125 : vector<1x128xf32>
    %127 = vector.broadcast %119 : vector<1x128xf32> to vector<8x128xf32>
    %128 = arith.subf %113, %127 : vector<8x128xf32>
    %129 = vector.broadcast %114 : vector<1x128xf32> to vector<8x128xf32>
    %130 = arith.mulf %129, %128 : vector<8x128xf32>
    %cst_53 = arith.constant 9.99999974E-6 : f32
    %131 = vector.broadcast %cst_53 : f32 to vector<1x128xf32>
    %132 = arith.addf %126, %131 : vector<1x128xf32>
    %133 = math.rsqrt %132 : vector<1x128xf32>
    %134 = vector.broadcast %133 : vector<1x128xf32> to vector<8x128xf32>
    %135 = arith.mulf %130, %134 : vector<8x128xf32>
    %136 = vector.broadcast %115 : vector<1x128xf32> to vector<8x128xf32>
    %137 = arith.addf %135, %136 : vector<8x128xf32>
    %138 = arith.truncf %137 : vector<8x128xf32> to vector<8x128xbf16>
    %c3_54 = arith.constant 3 : index
    %c0_55 = arith.constant 0 : index
    %c0_56 = arith.constant 0 : index
    %139 = vector.load %arg3[%c3_54, %c0_55, %c0_56] : memref<4x128x128xbf16, #tpu.memory_space<vmem>>, vector<1x128x128xbf16>
    %140 = vector.shape_cast %139 : vector<1x128x128xbf16> to vector<128x128xbf16>
    %cst_57 = arith.constant dense<0.000000e+00> : vector<8x128xf32>
    %141 = tpu.matmul %138, %140, %cst_57 {dimension_numbers = #tpu.dot_dimension_numbers<[1], [0], [0], [1], [0, 0, 1, 1], [], []>} : vector<8x128xbf16>, vector<128x128xbf16>, vector<8x128xf32> -> vector<8x128xf32>
    %c12 = arith.constant 12 : index
    %c0_58 = arith.constant 0 : index
    %142 = vector.load %arg2[%c12, %c0_58] : memref<13x128xf32, #tpu.memory_space<vmem>>, vector<1x128xf32>
    %143 = vector.broadcast %142 : vector<1x128xf32> to vector<8x128xf32>
    %144 = arith.addf %141, %143 : vector<8x128xf32>
    %c0_59 = arith.constant 0 : index
    %c0_60 = arith.constant 0 : index
    %145 = vector.load %arg4[%c0_59, %c0_60] : memref<8x128xf32, #tpu.memory_space<vmem>>, vector<8x128xf32>
    tpu.vector_store %arg4[%c0_59, %c0_60], %144 {strides = array<i32>} : memref<8x128xf32, #tpu.memory_space<vmem>>, vector<8x128xf32>,
    return
  }
}

</mosaic_0001>

<bundles_post_ra>
// kernel: tpu_custom_call.1
= control target key start
LH: loop header
LB: loop body
LE: loop exit
PB: predicated region body
PF: predicated region fallthrough
CT: control target
= control target key end

     0   :  { %9 = vsyncpa [#allocation3], 0  ;;  %s1239_s0 = inlined_call_operand.vmem [shape: f32[8,36], index: 0, kind: input, shape index: {}]   ;;  %s1240_s1 = inlined_call_operand.vmem [shape: bf16[2,36,128], index: 1, kind: input, shape index: {}]   ;;  %s1241_s2 = inlined_call_operand.vmem [shape: f32[13,128], index: 2, kind: input, shape index: {}]   ;;  %s1242_s3 = inlined_call_operand.hbm [shape: bf16[4,128,128], index: 3, kind: input, shape index: {}]   ;;  %s1243_s4 = inlined_call_operand.hbm [shape: f32[8,128], index: 4, kind: output, shape index: {}]  }
   0x1   :  { %10 = vsyncpa [#allocation4], 0  ;;  %s1074_s15 = smov [#allocation2]   ;;  %s1026_s19 = scalar_lea.hbm %s1242_s3, 4096 }
   0x2   :  { %s22_s16 = sshll.u32 %s1074_s15, 4  ;;  %p1027_p0 = scmp.ne.s32.totalorder %s1242_s3, %s1026_s19  ;;  %s23_s16 = int_to_ptr.vmem [resolvable:$true] %s22_s16 }
   0x3   :  { %p1030_p1 = scmp.lt.u32.totalorder %s1026_s19, %s1242_s3 }
   0x5   :  { %p1032_p2 = pnand %p1030_p1, %p1027_p0 }
   0x7   :  { %1035 = shalt.err (!%p1032_p2)
}
   0x8   :  { %s1036_s24 = scalar_lea.vmem %s23_s16, 4096  ;;  %p1041_p4 = scmp.lt.s32.totalorder %s23_s16, %s23_s16 }
   0x9   :  { %p1037_p3 = scmp.ne.s32.totalorder %s23_s16, %s1036_s24  ;;  %p1042_p5 = scmp.lt.s32.totalorder %s1036_s24, %s1036_s24 }
   0xb   :  { %p1043_p6 = por %p1042_p5, %p1041_p4 }
   0xd   :  { %p1044_p7 = pnand %p1043_p6, %p1037_p3 }
   0xf   :  { %1047 = shalt.err (!%p1044_p7)
}
  0x10   :  { %s1075_s25 = smov 64   ;;  %s1076_s26 = smov 4  }
  0x11   :  { %28 = dma.hbm_to_vmem [thread:$0]  %s1242_s3, 4096, %s23_s16, [#allocation3], %s1075_s25, %s1075_s25, %s1076_s26  }
  0x12   :  { %1070 = dma.done.wait [#allocation3], 4096  }
  0x13   :  { %1071 = vsyncadd [#allocation3], 4294963200  ;;  %v1077_v0 = vmov 0.0   ;;  %vm1078_vm0 = vmmov 0   ;;  %v974_v1 = vld [vmem:[%s1240_s1] sm:$0xff]   ;;  %v975_v2 = vld [vmem:[%s1240_s1 + $0x14] sm:$0xff]   ;;  %v174_v19 = vlaneseq }
  0x14   :  { %868 = vmatprep.subr.bf16.mxu0 %v1077_v0  ;;  %878 = vmatprep.subr.bf16.mxu1 %v1077_v0  ;;  %v976_v3 = vld [vmem:[%s1240_s1 + $0x8] sm:$0xff]   ;;  %v977_v4 = vld [vmem:[%s1240_s1 + $0x1c] sm:$0xff]   ;;  %v978_v5 = vld [vmem:[%s1240_s1 + $0x10] ss:$0 sps:$4 sm:$0x33]   ;;  %vm59_vm1 = vcmask 1041408  }
  0x15   :  { %874 = vmatprep.mubr.msk.bf16.mxu0 %vm1078_vm0, %v1077_v0  ;;  %884 = vmatprep.mubr.msk.bf16.mxu1 %vm1078_vm0, %v1077_v0  ;;  %v979_v6 = vld [vmem:[%s1240_s1 + $0x24] ss:$0 sps:$4 sm:$0x33]   ;;  %vm55_vm2 = vcmask 293888   ;;  %v61_v8 = vsel %vm59_vm1, %v978_v5, 0  ;;  %v981_v12 = vld [vmem:[#allocation2 + $0x8] sm:$0xff]  }
  0x16   :  { %869 = vmatpush3.bf16.msra.mxu0 %v974_v1  ;;  %879 = vmatpush3.bf16.msra.mxu1 %v975_v2  ;;  %v33_v7 = vld [vmem:[%s1239_s0] sm:$0xff]  ;;  %v125_v9 = vsel %vm59_vm1, %v979_v6, 0  ;;  %v982_v13 = vld [vmem:[#allocation2 + $0x10] sm:$0xff]   ;;  %v983_v14 = vld [vmem:[#allocation2 + $0x18] sm:$0xff]   ;;  %v175_v23 = vand.u32 127, %v174_v19  ;;  %s1079_s13 = smov [#allocation5]  }
  0x17   :  { %870 = vmatprep.subr.bf16.mxu0 %v1077_v0  ;;  %880 = vmatprep.subr.bf16.mxu1 %v1077_v0  ;;  %v34_v10 = vpack.c.bf16 %v33_v7, %v33_v7  ;;  %v980_v11 = vld [vmem:[#allocation2] sm:$0xff]   ;;  %v985_v16 = vld [vmem:[#allocation2 + $0x28] sm:$0xff]   ;;  %v986_v17 = vld [vmem:[#allocation2 + $0x30] sm:$0xff]   ;;  %s757_s14 = sshll.u32 %s1079_s13, 4  ;;  %s758_s14 = int_to_ptr.vmem [resolvable:$true] %s757_s14 }
  0x18   :  { %v984_v15 = vld [vmem:[#allocation2 + $0x20] sm:$0xff]   ;;  %v987_v18 = vld [vmem:[#allocation2 + $0x38] sm:$0xff]   ;;  %vm176_vm3 = vcmp.lt.s32.totalorder %v175_v23, 64  ;;  %v989_v59 = vld [vmem:[#allocation2 + $0x48] sm:$0xff]   ;;  %s1048_s15 = scalar_lea.vmem %s758_s14, 128  ;;  %p1053_p9 = scmp.lt.s32.totalorder %s758_s14, %s758_s14 }
  0x19   :  { %v779_v22 = vld [vmem:[%s1241_s2] ss:$0 sm:$0xff]  ;;  %v780_v51 = vld [vmem:[%s1241_s2 + $0x1] ss:$0 sm:$0xff]  ;;  %v781_v54 = vld [vmem:[%s1241_s2 + $0x2] ss:$0 sm:$0xff]  ;;  %p1049_p8 = scmp.ne.s32.totalorder %s758_s14, %s1048_s15  ;;  %p1054_p10 = scmp.lt.s32.totalorder %s1048_s15, %s1048_s15 }
  0x1a   :  { %871 = vmatpush3.bf16.msra.mxu0 %v976_v3  ;;  %881 = vmatpush3.bf16.msra.mxu1 %v977_v4  ;;  %v988_v58 = vld [vmem:[#allocation2 + $0x40] sm:$0xff]   ;;  %v990_v60 = vld [vmem:[#allocation2 + $0x50] sm:$0xff]   ;;  %v991_v61 = vld [vmem:[#allocation2 + $0x58] sm:$0xff]  }
  0x1b   :  { %872 = vmatprep.subr.bf16.mxu0 %v1077_v0  ;;  %882 = vmatprep.subr.bf16.mxu1 %v1077_v0  ;;  %v992_v62 = vld [vmem:[#allocation2 + $0x60] sm:$0xff]   ;;  %v993_v63 = vld [vmem:[#allocation2 + $0x68] sm:$0xff]   ;;  %v994_v1 = vld [vmem:[#allocation2 + $0x70] sm:$0xff]   ;;  %p1055_p11 = por %p1054_p10, %p1053_p9 }
  0x1c   :  { %v995_v2 = vld [vmem:[#allocation2 + $0x78] sm:$0xff]   ;;  %v782_v3 = vld [vmem:[%s1241_s2 + $0x3] ss:$0 sm:$0xff] }
  0x1d   :  { %p1056_p12 = pnand %p1055_p11, %p1049_p8 }
  0x1e   :  { %873 = vmatpush3.bf16.msra.mxu0 %v61_v8  ;;  %883 = vmatpush3.bf16.msra.mxu1 %v125_v9 }
  0x1f   :  { %888 = vmatprep.subr.bf16.mxu0 %v1077_v0  ;;  %908 = vmatprep.subr.bf16.mxu1 %v1077_v0 }
  0x21   :  { %875 = vmatmul.mubr.msk.bf16.vlgmr.msra.gmra.mrb[0].mxu0 %vm55_vm2, %v34_v10  ;;  %885 = vmatmul.mubr.msk.bf16.vlgmr.msra.gmra.mrb[0].mxu1 %vm55_vm2, %v34_v10 }
  0x22   :  { %904 = vmatprep.mubr.msk.bf16.mxu0 %vm1078_vm0, %v1077_v0  ;;  %924 = vmatprep.mubr.msk.bf16.mxu1 %vm1078_vm0, %v1077_v0 }
  0x23   :  { %889 = vmatpush3.bf16.msra.mxu0 %v980_v11  ;;  %909 = vmatpush3.bf16.msra.mxu1 %v988_v58 }
  0x24   :  { %890 = vmatprep.subr.bf16.mxu0 %v1077_v0  ;;  %910 = vmatprep.subr.bf16.mxu1 %v1077_v0 }
  0x27   :  { %891 = vmatpush3.bf16.msra.mxu0 %v981_v12  ;;  %911 = vmatpush3.bf16.msra.mxu1 %v989_v59 }
  0x28   :  { %892 = vmatprep.subr.bf16.mxu0 %v1077_v0  ;;  %912 = vmatprep.subr.bf16.mxu1 %v1077_v0 }
  0x2b   :  { %893 = vmatpush3.bf16.msra.mxu0 %v982_v13  ;;  %913 = vmatpush3.bf16.msra.mxu1 %v990_v60 }
  0x2c   :  { %894 = vmatprep.subr.bf16.mxu0 %v1077_v0  ;;  %914 = vmatprep.subr.bf16.mxu1 %v1077_v0 }
  0x2f   :  { %895 = vmatpush3.bf16.msra.mxu0 %v983_v14  ;;  %915 = vmatpush3.bf16.msra.mxu1 %v991_v61 }
  0x30   :  { %896 = vmatprep.subr.bf16.mxu0 %v1077_v0  ;;  %916 = vmatprep.subr.bf16.mxu1 %v1077_v0 }
  0x33   :  { %897 = vmatpush3.bf16.msra.mxu0 %v984_v15  ;;  %917 = vmatpush3.bf16.msra.mxu1 %v992_v62 }
  0x34   :  { %898 = vmatprep.subr.bf16.mxu0 %v1077_v0  ;;  %918 = vmatprep.subr.bf16.mxu1 %v1077_v0 }
  0x37   :  { %899 = vmatpush3.bf16.msra.mxu0 %v985_v16  ;;  %919 = vmatpush3.bf16.msra.mxu1 %v993_v63 }
  0x38   :  { %900 = vmatprep.subr.bf16.mxu0 %v1077_v0  ;;  %920 = vmatprep.subr.bf16.mxu1 %v1077_v0 }
  0x3b   :  { %901 = vmatpush3.bf16.msra.mxu0 %v986_v17  ;;  %921 = vmatpush3.bf16.msra.mxu1 %v994_v1 }
  0x3c   :  { %902 = vmatprep.subr.bf16.mxu0 %v1077_v0  ;;  %922 = vmatprep.subr.bf16.mxu1 %v1077_v0 }
  0x3f   :  { %903 = vmatpush3.bf16.msra.mxu0 %v987_v18  ;;  %923 = vmatpush3.bf16.msra.mxu1 %v995_v2 }
  0x40   :  { %928 = vmatprep.subr.bf16.mxu0 %v1077_v0  ;;  %948 = vmatprep.subr.bf16.mxu1 %v1077_v0 }
  0xf4   :  { %v97_v20 = vpop.f32.mrb[0].mxu0  ;;  %v161_v21 = vpop.f32.mrb[0].mxu1 }
  0xf5   :  { %v876_v24 = vpop.f32.mrb[1].mxu0  ;;  %v167_v25 = vmax.f32 %v97_v20, %v161_v21  ;;  %v886_v26 = vpop.f32.mrb[1].mxu1 }
  0xf6   :  { %v100_v27 = vpop.f32.mrb[2].mxu0  ;;  %v164_v28 = vpop.f32.mrb[2].mxu1 }
  0xf7   :  { %v877_v29 = vpop.f32.mrb[3].mxu0  ;;  %v173_v30 = vadd.f32 %v779_v22, %v167_v25  ;;  %v887_v31 = vpop.f32.mrb[3].mxu1  ;;  %v791_v27 = vld [vmem:[%s1241_s2 + $0x4] ss:$0 sm:$0xff] }
  0xf9   :  { %v177_v32 = vmax.f32 %v173_v30, 0.0 }
  0xfb   :  { %v178_v33 = vsel %vm176_vm3, %v177_v32, %v173_v30  ;;  %v792_v30 = vld [vmem:[%s1241_s2 + $0x5] ss:$0 sm:$0xff] }
  0xfc   :  { %v181_v34 = vrot.slane %v178_v33, 4 }
  0xfe   :  { %v182_v35 = vadd.f32 %v181_v34, %v178_v33  ;;  %v996_v34 = vld [vmem:[#allocation2 + $0x80] sm:$0xff]  }
 0x100   :  { %v183_v36 = vrot.slane %v182_v35, 2 }
 0x102   :  { %v184_v37 = vadd.f32 %v183_v36, %v182_v35  ;;  %v997_v35 = vld [vmem:[#allocation2 + $0x88] sm:$0xff]   ;;  %v998_v36 = vld [vmem:[#allocation2 + $0x90] sm:$0xff]  }
 0x104   :  { %v185_v38 = vrot.slane %v184_v37, 1 }
 0x106   :  { %v186_v39 = vadd.f32 %v185_v38, %v184_v37  ;;  %v999_v37 = vld [vmem:[#allocation2 + $0x98] sm:$0xff]   ;;  %v1000_v38 = vld [vmem:[#allocation2 + $0xa0] sm:$0xff]  }
 0x108   :  { %v188_v40 = vmul.f32 0.125, %v186_v39  ;;  %v1001_v39 = vld [vmem:[#allocation2 + $0xa8] sm:$0xff]  }
 0x10a   :  { %v189_v41 = vsub.f32 %v178_v33, %v188_v40  ;;  %v1002_v40 = vld [vmem:[#allocation2 + $0xb0] sm:$0xff]  }
 0x10c   :  { %v190_v42 = vmul.f32 %v189_v41, %v189_v41  ;;  %v202_v52 = vmul.f32 %v780_v51, %v189_v41  ;;  %v1003_v41 = vld [vmem:[#allocation2 + $0xb8] sm:$0xff]  }
 0x10e   :  { %v191_v43 = vrot.slane %v190_v42, 4 }
 0x110   :  { %v192_v44 = vadd.f32 %v191_v43, %v190_v42  ;;  %v793_v42 = vld [vmem:[%s1241_s2 + $0x6] ss:$0 sm:$0xff] }
 0x112   :  { %v193_v45 = vrot.slane %v192_v44, 2 }
 0x114   :  { %v194_v46 = vadd.f32 %v193_v45, %v192_v44 }
 0x116   :  { %v195_v47 = vrot.slane %v194_v46, 1 }
 0x118   :  { %v196_v48 = vadd.f32 %v195_v47, %v194_v46 }
 0x11a   :  { %v197_v49 = vmul.f32 0.125, %v196_v48 }
 0x11c   :  { %v203_v50 = vadd.f32 1e-05, %v197_v49 }
 0x11e   :  { %1012 = vrsqrt.f32 %v203_v50 }
 0x128   :  { %v1013_v53 = vpop.eup %1012 }
 0x129   :  { %v205_v55 = vmul.f32 %v1013_v53, %v202_v52 }
 0x12b   :  { %v210_v56 = vadd.f32 %v781_v54, %v205_v55 }
 0x12d   :  { %v211_v57 = vpack.c.bf16 %v210_v56, %v210_v56 }
 0x12f   :  { %905 = vmatmul.mubr.bf16.vlgmr.msra.gmra.mrb[4].mxu0 %v211_v57 }
 0x130   :  { %944 = vmatprep.mubr.msk.bf16.mxu0 %vm1078_vm0, %v1077_v0  ;;  %929 = vmatpush3.bf16.msra.mxu0 %v996_v34 }
 0x131   :  { %930 = vmatprep.subr.bf16.mxu0 %v1077_v0 }
 0x134   :  { %931 = vmatpush3.bf16.msra.mxu0 %v997_v35 }
 0x135   :  { %932 = vmatprep.subr.bf16.mxu0 %v1077_v0 }
 0x138   :  { %933 = vmatpush3.bf16.msra.mxu0 %v998_v36 }
 0x139   :  { %934 = vmatprep.subr.bf16.mxu0 %v1077_v0 }
 0x13c   :  { %935 = vmatpush3.bf16.msra.mxu0 %v999_v37 }
 0x13d   :  { %936 = vmatprep.subr.bf16.mxu0 %v1077_v0 }
 0x140   :  { %937 = vmatpush3.bf16.msra.mxu0 %v1000_v38 }
 0x141   :  { %938 = vmatprep.subr.bf16.mxu0 %v1077_v0 }
 0x144   :  { %939 = vmatpush3.bf16.msra.mxu0 %v1001_v39 }
 0x145   :  { %940 = vmatprep.subr.bf16.mxu0 %v1077_v0 }
 0x148   :  { %941 = vmatpush3.bf16.msra.mxu0 %v1002_v40 }
 0x149   :  { %942 = vmatprep.subr.bf16.mxu0 %v1077_v0 }
 0x14c   :  { %943 = vmatpush3.bf16.msra.mxu0 %v1003_v41  ;;  %v813_v41 = vld [vmem:[%s1241_s2 + $0xa] ss:$0 sm:$0xff] }
 0x202   :  { %v315_v4 = vpop.f32.mrb[4].mxu0 }
 0x203   :  { %v316_v5 = vadd.f32 %v782_v3, %v315_v4  ;;  %v906_v6 = vpop.f32.mrb[5].mxu0  ;;  %v802_v3 = vld [vmem:[%s1241_s2 + $0x7] ss:$0 sm:$0xff] }
 0x204   :  { %v318_v7 = vpop.f32.mrb[6].mxu0  ;;  %v803_v6 = vld [vmem:[%s1241_s2 + $0x8] ss:$0 sm:$0xff] }
 0x205   :  { %1014 = vtanh.f32 %v316_v5  ;;  %v907_v8 = vpop.f32.mrb[7].mxu0 }
 0x20f   :  { %v1015_v9 = vpop.eup %1014 }
 0x210   :  { %v324_v10 = vrot.slane %v1015_v9, 4 }
 0x212   :  { %v325_v11 = vadd.f32 %v1015_v9, %v324_v10  ;;  %v1004_v10 = vld [vmem:[#allocation2 + $0xc0] sm:$0xff]  }
 0x214   :  { %v326_v12 = vrot.slane %v325_v11, 2 }
 0x216   :  { %v327_v13 = vadd.f32 %v326_v12, %v325_v11  ;;  %v1005_v11 = vld [vmem:[#allocation2 + $0xc8] sm:$0xff]   ;;  %v1006_v12 = vld [vmem:[#allocation2 + $0xd0] sm:$0xff]  }
 0x218   :  { %v328_v14 = vrot.slane %v327_v13, 1 }
 0x21a   :  { %v329_v15 = vadd.f32 %v328_v14, %v327_v13  ;;  %v1007_v13 = vld [vmem:[#allocation2 + $0xd8] sm:$0xff]   ;;  %v1008_v14 = vld [vmem:[#allocation2 + $0xe0] sm:$0xff]  }
 0x21c   :  { %v330_v16 = vmul.f32 0.125, %v329_v15  ;;  %v1009_v15 = vld [vmem:[#allocation2 + $0xe8] sm:$0xff]  }
 0x21e   :  { %v331_v17 = vsub.f32 %v1015_v9, %v330_v16  ;;  %v1010_v16 = vld [vmem:[#allocation2 + $0xf0] sm:$0xff]  }
 0x220   :  { %v332_v18 = vmul.f32 %v331_v17, %v331_v17  ;;  %v344_v28 = vmul.f32 %v791_v27, %v331_v17  ;;  %v1011_v17 = vld [vmem:[#allocation2 + $0xf8] sm:$0xff]  }
 0x222   :  { %v333_v19 = vrot.slane %v332_v18, 4 }
 0x224   :  { %v334_v20 = vadd.f32 %v333_v19, %v332_v18  ;;  %v804_v18 = vld [vmem:[%s1241_s2 + $0x9] ss:$0 sm:$0xff] }
 0x226   :  { %v335_v21 = vrot.slane %v334_v20, 2 }
 0x228   :  { %v336_v22 = vadd.f32 %v335_v21, %v334_v20 }
 0x22a   :  { %v337_v23 = vrot.slane %v336_v22, 1 }
 0x22c   :  { %v338_v24 = vadd.f32 %v337_v23, %v336_v22 }
 0x22e   :  { %v339_v25 = vmul.f32 0.125, %v338_v24 }
 0x230   :  { %v345_v26 = vadd.f32 1e-05, %v339_v25 }
 0x232   :  { %1016 = vrsqrt.f32 %v345_v26 }
 0x23c   :  { %v1017_v29 = vpop.eup %1016 }
 0x23d   :  { %v347_v31 = vmul.f32 %v1017_v29, %v344_v28 }
 0x23f   :  { %v352_v32 = vadd.f32 %v792_v30, %v347_v31 }
 0x241   :  { %v353_v33 = vpack.c.bf16 %v352_v32, %v352_v32 }
 0x243   :  { %925 = vmatmul.mubr.bf16.vlgmr.msra.gmra.mrb[4].mxu1 %v353_v33 }
 0x244   :  { %964 = vmatprep.mubr.msk.bf16.mxu1 %vm1078_vm0, %v1077_v0  ;;  %949 = vmatpush3.bf16.msra.mxu1 %v1004_v10 }
 0x245   :  { %950 = vmatprep.subr.bf16.mxu1 %v1077_v0 }
 0x248   :  { %951 = vmatpush3.bf16.msra.mxu1 %v1005_v11 }
 0x249   :  { %952 = vmatprep.subr.bf16.mxu1 %v1077_v0 }
 0x24c   :  { %953 = vmatpush3.bf16.msra.mxu1 %v1006_v12 }
 0x24d   :  { %954 = vmatprep.subr.bf16.mxu1 %v1077_v0 }
 0x250   :  { %955 = vmatpush3.bf16.msra.mxu1 %v1007_v13 }
 0x251   :  { %956 = vmatprep.subr.bf16.mxu1 %v1077_v0 }
 0x254   :  { %957 = vmatpush3.bf16.msra.mxu1 %v1008_v14 }
 0x255   :  { %958 = vmatprep.subr.bf16.mxu1 %v1077_v0 }
 0x258   :  { %959 = vmatpush3.bf16.msra.mxu1 %v1009_v15 }
 0x259   :  { %960 = vmatprep.subr.bf16.mxu1 %v1077_v0 }
 0x25c   :  { %961 = vmatpush3.bf16.msra.mxu1 %v1010_v16 }
 0x25d   :  { %962 = vmatprep.subr.bf16.mxu1 %v1077_v0 }
 0x260   :  { %963 = vmatpush3.bf16.msra.mxu1 %v1011_v17 }
 0x316   :  { %v458_v43 = vpop.f32.mrb[4].mxu1 }
 0x317   :  { %v459_v44 = vadd.f32 %v793_v42, %v458_v43  ;;  %v926_v45 = vpop.f32.mrb[5].mxu1 }
 0x318   :  { %v461_v46 = vpop.f32.mrb[6].mxu1 }
 0x319   :  { %1018 = vtanh.f32 %v459_v44  ;;  %v927_v47 = vpop.f32.mrb[7].mxu1  ;;  %v814_v44 = vld [vmem:[%s1241_s2 + $0xb] ss:$0 sm:$0xff] }
 0x323   :  { %v1019_v48 = vpop.eup %1018 }
 0x324   :  { %v467_v49 = vrot.slane %v1019_v48, 4 }
 0x326   :  { %v468_v50 = vadd.f32 %v1019_v48, %v467_v49 }
 0x328   :  { %v469_v51 = vrot.slane %v468_v50, 2 }
 0x32a   :  { %v470_v52 = vadd.f32 %v469_v51, %v468_v50 }
 0x32c   :  { %v471_v53 = vrot.slane %v470_v52, 1 }
 0x32e   :  { %v472_v54 = vadd.f32 %v471_v53, %v470_v52 }
 0x330   :  { %v473_v55 = vmul.f32 0.125, %v472_v54 }
 0x332   :  { %v474_v56 = vsub.f32 %v1019_v48, %v473_v55  ;;  %v815_v48 = vld [vmem:[%s1241_s2 + $0xc] ss:$0 sm:$0xff] }
 0x334   :  { %v475_v57 = vmul.f32 %v474_v56, %v474_v56  ;;  %v487_v4 = vmul.f32 %v802_v3, %v474_v56 }
 0x336   :  { %v476_v58 = vrot.slane %v475_v57, 4 }
 0x338   :  { %v477_v59 = vadd.f32 %v476_v58, %v475_v57 }
 0x33a   :  { %v478_v60 = vrot.slane %v477_v59, 2 }
 0x33c   :  { %v479_v61 = vadd.f32 %v478_v60, %v477_v59 }
 0x33e   :  { %v480_v62 = vrot.slane %v479_v61, 1 }
 0x340   :  { %v481_v63 = vadd.f32 %v480_v62, %v479_v61 }
 0x342   :  { %v482_v1 = vmul.f32 0.125, %v481_v63 }
 0x344   :  { %v488_v2 = vadd.f32 1e-05, %v482_v1 }
 0x346   :  { %1020 = vrsqrt.f32 %v488_v2 }
 0x350   :  { %v1021_v5 = vpop.eup %1020 }
 0x351   :  { %v490_v7 = vmul.f32 %v1021_v5, %v487_v4 }
 0x353   :  { %v495_v8 = vadd.f32 %v803_v6, %v490_v7 }
 0x355   :  { %v496_v9 = vpack.c.bf16 %v495_v8, %v495_v8 }
 0x357   :  { %945 = vmatmul.mubr.bf16.vlgmr.msra.gmra.mrb[8].mxu0 %v496_v9 }
 0x42a   :  { %v601_v19 = vpop.f32.mrb[8].mxu0 }
 0x42b   :  { %v602_v20 = vadd.f32 %v804_v18, %v601_v19  ;;  %v946_v21 = vpop.f32.mrb[9].mxu0 }
 0x42c   :  { %v604_v22 = vpop.f32.mrb[10].mxu0 }
 0x42d   :  { %1022 = vtanh.f32 %v602_v20  ;;  %v947_v23 = vpop.f32.mrb[11].mxu0 }
 0x437   :  { %v1023_v24 = vpop.eup %1022 }
 0x438   :  { %v610_v25 = vrot.slane %v1023_v24, 4 }
 0x43a   :  { %v611_v26 = vadd.f32 %v1023_v24, %v610_v25 }
 0x43c   :  { %v612_v27 = vrot.slane %v611_v26, 2 }
 0x43e   :  { %v613_v28 = vadd.f32 %v612_v27, %v611_v26 }
 0x440   :  { %v614_v29 = vrot.slane %v613_v28, 1 }
 0x442   :  { %v615_v30 = vadd.f32 %v614_v29, %v613_v28 }
 0x444   :  { %v616_v31 = vmul.f32 0.125, %v615_v30 }
 0x446   :  { %v617_v0 = vsub.f32 %v1023_v24, %v616_v31 }
 0x448   :  { %v618_v32 = vmul.f32 %v617_v0, %v617_v0  ;;  %v630_v42 = vmul.f32 %v813_v41, %v617_v0 }
 0x44a   :  { %v619_v33 = vrot.slane %v618_v32, 4 }
 0x44c   :  { %v620_v34 = vadd.f32 %v619_v33, %v618_v32 }
 0x44e   :  { %v621_v35 = vrot.slane %v620_v34, 2 }
 0x450   :  { %v622_v36 = vadd.f32 %v621_v35, %v620_v34 }
 0x452   :  { %v623_v37 = vrot.slane %v622_v36, 1 }
 0x454   :  { %v624_v38 = vadd.f32 %v623_v37, %v622_v36 }
 0x456   :  { %v625_v39 = vmul.f32 0.125, %v624_v38 }
 0x458   :  { %v631_v40 = vadd.f32 1e-05, %v625_v39 }
 0x45a   :  { %1024 = vrsqrt.f32 %v631_v40 }
 0x464   :  { %v1025_v43 = vpop.eup %1024 }
 0x465   :  { %v633_v45 = vmul.f32 %v1025_v43, %v630_v42 }
 0x467   :  { %v638_v46 = vadd.f32 %v814_v44, %v633_v45 }
 0x469   :  { %v639_v47 = vpack.c.bf16 %v638_v46, %v638_v46 }
 0x46b   :  { %965 = vmatmul.mubr.bf16.vlgmr.msra.gmra.mrb[8].mxu1 %v639_v47 }
 0x53e   :  { %v744_v49 = vpop.f32.mrb[8].mxu1 }
 0x53f   :  { %v745_v50 = vadd.f32 %v815_v48, %v744_v49  ;;  %v966_v51 = vpop.f32.mrb[9].mxu1 }
 0x540   :  { %v747_v52 = vpop.f32.mrb[10].mxu1 }
 0x541   :  { %750 = vst [vmem:[#allocation5] sm:$0xff] %v745_v50  ;;  %v967_v53 = vpop.f32.mrb[11].mxu1 }
 0x542   :  { %1059 = shalt.err (!%p1056_p12)
}
 0x543   :  { %s1060_s2 = scalar_lea.hbm %s1243_s4, 128 }
 0x544   :  { %p1061_p13 = scmp.ne.s32.totalorder %s1243_s4, %s1060_s2  ;;  %p1064_p0 = scmp.lt.u32.totalorder %s1060_s2, %s1243_s4 }
 0x546   :  { %p1066_p1 = pnand %p1064_p0, %p1061_p13 }
 0x548   :  { %1069 = shalt.err (!%p1066_p1)
}
 0x549   :  { %760 = dma.vmem_to_hbm [thread:$0]  %s758_s14, 128, %s1243_s4, [#allocation4]  }
 0x54a   :  { %1072 = dma.done.wait [#allocation4], 128  }
 0x54b   :  { %1073 = vsyncadd [#allocation4], 4294967168 }
 0x54c   :  { %764 = vsyncpa [#allocation3], 1 }
 0x54d   :  { %765 = vsyncpa [#allocation4], 1 }

</bundles_post_ra>
